<compile_context>
chip_gen: v5e
topology: v5e:2x2
jax: 0.10.0
libtpu: 0.0.40
codegen_flags: <defaults>
</compile_context>

<pallas_src>
import functools

import jax
import jax.numpy as jnp
from jax import lax
from jax.experimental import pallas as pl
from jax.experimental.pallas import tpu as pltpu

# ---------------------------------------------------------------------------
# Tiling plan
# ---------------------------------------------------------------------------
_LANE_WIDTHS = (1024, 512, 256, 128)   # preferred lane-dense slab widths
_TARGET_BLOCK_ELEMS = 512 * 1024       # ~2 MiB f32 per operand block
_VMEM_LIMIT_BYTES = 48 * 1024 * 1024   # raised scoped-VMEM limit (< 64 MiB v7x phys)


def _plan(n):
    """Layout plan for a flat array of n elements.

    Returns python ints (lane, rows, block_rows, n_pad, rem_rows); rem_rows is
    None unless the final grid block is ragged in the row dimension.
    """
    for w in _LANE_WIDTHS:
        if n % w == 0:
            lane = w
            break
    else:
        lane = 512                      # ragged tail zero-padded (benign)
    n_pad = -(-n // lane) * lane
    rows = n_pad // lane

    max_rows = max(1, _TARGET_BLOCK_ELEMS // lane)   # multiple of 8 for all widths
    if rows <= max_rows:
        block_rows = rows               # single block == full array dims
    else:
        block_rows = max(8, (max_rows // 8) * 8)

    steps = -(-rows // block_rows)
    rem = rows - (steps - 1) * block_rows
    rem_rows = None if rem == block_rows else rem
    return lane, rows, block_rows, n_pad, rem_rows


def _to_slab(x, n, n_pad, rows, lane):
    """Flatten row-major to a lane-dense (rows, lane) slab (pad only if needed)."""
    flat = x.reshape(-1)
    if n_pad != n:
        flat = jnp.pad(flat, (0, n_pad - n))
    return flat.reshape(rows, lane)


def _mask_ragged(x, rem_rows):
    """Zero the stale rows of a ragged final grid block (static per-call plan)."""
    if rem_rows is None:
        return x
    limit = jnp.where(pl.program_id(0) == pl.num_programs(0) - 1,
                      rem_rows, x.shape[0])
    keep = lax.broadcasted_iota(jnp.int32, x.shape, 0) < limit
    return jnp.where(keep, x, 0.0)


# ---------------------------------------------------------------------------
# Kernels
# ---------------------------------------------------------------------------
def _elem_kernel(p_ref, o_ref, *, scale):
    # loss = pred * (0.5 * loss_weight), computed in f32, stored in input dtype
    o_ref[...] = (p_ref[...].astype(jnp.float32)
                  * jnp.float32(scale)).astype(o_ref.dtype)


def _elem_kernel_w(p_ref, w_ref, o_ref, *, scale):
    o_ref[...] = (p_ref[...].astype(jnp.float32)
                  * w_ref[...].astype(jnp.float32)
                  * jnp.float32(scale)).astype(o_ref.dtype)


def _sum_kernel(p_ref, o_ref, acc_ref, *, scale, rem_rows):
    step = pl.program_id(0)

    @pl.when(step == 0)
    def _():
        acc_ref[...] = jnp.zeros_like(acc_ref)

    x = _mask_ragged(p_ref[...].astype(jnp.float32), rem_rows)
    acc_ref[...] += x                                   # VPU-only per-step work

    @pl.when(step == pl.num_programs(0) - 1)
    def _():
        # Single cross-lane/sublane reduction + scalar write, once at the end.
        o_ref[...] = jnp.sum(acc_ref[...], keepdims=True) * jnp.float32(scale)


def _sum_kernel_w(p_ref, w_ref, o_ref, acc_ref, *, scale, rem_rows):
    step = pl.program_id(0)

    @pl.when(step == 0)
    def _():
        acc_ref[...] = jnp.zeros_like(acc_ref)

    x = p_ref[...].astype(jnp.float32) * w_ref[...].astype(jnp.float32)
    x = _mask_ragged(x, rem_rows)
    acc_ref[...] += x

    @pl.when(step == pl.num_programs(0) - 1)
    def _():
        o_ref[...] = jnp.sum(acc_ref[...], keepdims=True) * jnp.float32(scale)


# ---------------------------------------------------------------------------
# Wrappers
# ---------------------------------------------------------------------------
def _elementwise_loss(pred, weight, scale):
    n = pred.size
    lane, rows, block_rows, n_pad, _ = _plan(n)
    p2d = _to_slab(pred, n, n_pad, rows, lane)
    spec = pl.BlockSpec((block_rows, lane), lambda i: (i, 0))
    grid = (-(-rows // block_rows),)

    if weight is None:
        kernel = functools.partial(_elem_kernel, scale=scale)
        in_specs, args = [spec], (p2d,)
    else:
        w2d = _to_slab(weight, n, n_pad, rows, lane)
        kernel = functools.partial(_elem_kernel_w, scale=scale)
        in_specs, args = [spec, spec], (p2d, w2d)

    out2d = pl.pallas_call(
        kernel,
        out_shape=jax.ShapeDtypeStruct((rows, lane), pred.dtype),
        grid_spec=pltpu.PrefetchScalarGridSpec(
            num_scalar_prefetch=0, grid=grid, in_specs=in_specs, out_specs=spec),
        compiler_params=pltpu.CompilerParams(
            dimension_semantics=("parallel",),
            vmem_limit_bytes=_VMEM_LIMIT_BYTES),
    )(*args)

    out = out2d.reshape(-1)
    if n_pad != n:
        out = out[:n]
    return out.reshape(pred.shape)


def _sum_loss(pred, weight, scale):
    n = pred.size
    lane, rows, block_rows, n_pad, rem_rows = _plan(n)
    p2d = _to_slab(pred, n, n_pad, rows, lane)
    spec = pl.BlockSpec((block_rows, lane), lambda i: (i, 0))
    grid = (-(-rows // block_rows),)

    if weight is None:
        kernel = functools.partial(_sum_kernel, scale=scale, rem_rows=rem_rows)
        in_specs, args = [spec], (p2d,)
    else:
        w2d = _to_slab(weight, n, n_pad, rows, lane)
        kernel = functools.partial(_sum_kernel_w, scale=scale, rem_rows=rem_rows)
        in_specs, args = [spec, spec], (p2d, w2d)

    out = pl.pallas_call(
        kernel,
        out_shape=jax.ShapeDtypeStruct((1, 1), jnp.float32),
        grid_spec=pltpu.PrefetchScalarGridSpec(
            num_scalar_prefetch=0, grid=grid, in_specs=in_specs,
            out_specs=pl.BlockSpec((1, 1), lambda i: (0, 0)),
            scratch_shapes=[pltpu.VMEM((block_rows, lane), jnp.float32)]),
        compiler_params=pltpu.CompilerParams(
            dimension_semantics=("arbitrary",),
            vmem_limit_bytes=_VMEM_LIMIT_BYTES),
    )(*args)
    return out[0, 0]


def nll_loss_forward(
    pred,
    target=None,          # unused by the loss math (matches the PyTorch module)
    weight=None,
    avg_factor=None,
    reduction="mean",
    reduction_override=None,
    loss_weight=1.0,
):
    assert reduction_override in (None, "none", "mean", "sum")
    reduction = reduction_override if reduction_override else reduction

    if pred.size == 0:
        # matches `pred.sum() * 0` in the reference
        return (jnp.zeros((), dtype=pred.dtype) * loss_weight).astype(pred.dtype)

    if weight is not None:
        assert weight.size == pred.size

    if reduction == "none":
        return _elementwise_loss(pred, weight, scale=0.5 * float(loss_weight))

    if reduction == "sum":
        if avg_factor is not None:
            raise ValueError('avg_factor can not be used with reduction="sum"')
        total = _sum_loss(pred, weight, scale=0.5 * float(loss_weight))
        return total.astype(pred.dtype)

    # reduction == "mean"
    if avg_factor is None:
        total = _sum_loss(pred, weight,
                          scale=0.5 * float(loss_weight) / float(pred.size))
    elif isinstance(avg_factor, (int, float)):
        total = _sum_loss(pred, weight,
                          scale=0.5 * float(loss_weight) / float(avg_factor))
    else:
        # traced avg_factor: fold what is static, divide the scalar afterwards.
        total = _sum_loss(pred, weight, scale=0.5 * float(loss_weight)) / avg_factor
    return total.astype(pred.dtype)


# ---------------------------------------------------------------------------
# Demo / self-check
# ---------------------------------------------------------------------------
if __name__ == "__main__":
    key = jax.random.PRNGKey(0)
    kp, kt, kw, kp2, kw2 = jax.random.split(key, 5)

    # Small NCHW input (single-block fast path).
    pred = jax.random.normal(kp, (2, 4, 16, 16), dtype=jnp.float32)
    target = jax.random.normal(kt, (2, 4, 16, 16), dtype=jnp.float32)  # ignored
    weight = jax.random.uniform(kw, (2, 4, 16, 16), dtype=jnp.float32)

    out_mean = nll_loss_forward(pred, target)
    out_sum = nll_loss_forward(pred, target, reduction_override="sum")
    out_none = nll_loss_forward(pred, target, reduction_override="none")
    out_none_lw = nll_loss_forward(pred, target, weight=weight,
                                   reduction_override="none", loss_weight=2.0)
    out_wavg = nll_loss_forward(pred, target, weight=weight, avg_factor=100.0)

    # A larger shape exercising the multi-block + ragged-final-block path.
    pred_big = jax.random.normal(kp2, (2, 4, 300, 300), dtype=jnp.float32)
    weight_big = jax.random.uniform(kw2, (2, 4, 300, 300), dtype=jnp.float32)
    out_big_mean = nll_loss_forward(pred_big, None, weight=weight_big)
    out_big_none = nll_loss_forward(pred_big, None, reduction_override="none")

    jax.block_until_ready((out_mean, out_sum, out_none, out_none_lw, out_wavg,
                           out_big_mean, out_big_none))

    # Pure-JAX references.
    assert jnp.allclose(out_mean, jnp.mean(pred / 2), atol=1e-5, rtol=1e-5)
    assert jnp.allclose(out_sum, jnp.sum(pred / 2), atol=1e-4, rtol=1e-5)
    assert jnp.allclose(out_none, pred / 2, atol=1e-6, rtol=1e-6)
    assert out_none.shape == pred.shape
    assert jnp.allclose(out_none_lw, pred * weight, atol=1e-5, rtol=1e-5)
    assert jnp.allclose(out_wavg, jnp.sum(pred / 2 * weight) / 100.0,
                        atol=1e-5, rtol=1e-5)
    assert jnp.allclose(out_big_mean, jnp.mean(pred_big / 2 * weight_big),
                        atol=1e-4, rtol=1e-3)
    assert jnp.allclose(out_big_none, pred_big / 2, atol=1e-6, rtol=1e-6)
    assert out_big_none.shape == pred_big.shape

    print("KERNEL_OK")
</pallas_src>

<mosaic_0001>
module attributes {stable_mosaic.version = 11 : i64} {
  func.func @_sum_kernel(%arg0: i32, %arg1: memref<2x1024xf32, #tpu.memory_space<vmem>>, %arg2: memref<1x1xf32, #tpu.memory_space<vmem>>, %arg3: memref<2x1024xf32, #tpu.memory_space<vmem>>) attributes {dimension_semantics = [#tpu.dimension_semantics<arbitrary>], iteration_bounds = array<i64: 1>, scalar_prefetch = 0 : i64, scratch_operands = 1 : i64, tpu.core_type = #tpu.core_type<tc>, window_params = [{transform_indices = @transform_0, window_bounds = array<i64: 2, 1024>}, {pipeline_mode = #tpu.pipeline_mode<synchronous>, transform_indices = @transform_1, window_bounds = array<i64: 1, 1>}]} {
    %c0_i32 = arith.constant 0 : i32
    %0 = arith.cmpi eq, %arg0, %c0_i32 : i32
    %1 = arith.extui %0 : i1 to i32
    %c0_i32_0 = arith.constant 0 : i32
    %2 = arith.cmpi ne, %1, %c0_i32_0 : i32
    scf.if %2 {
      %cst = arith.constant 0.000000e+00 : f32
      %10 = vector.broadcast %cst : f32 to vector<2x1024xf32>
      %c0_8 = arith.constant 0 : index
      %c0_9 = arith.constant 0 : index
      %11 = vector.load %arg3[%c0_8, %c0_9] : memref<2x1024xf32, #tpu.memory_space<vmem>>, vector<2x1024xf32>
      tpu.vector_store %arg3[%c0_8, %c0_9], %10 {strides = array<i32>} : memref<2x1024xf32, #tpu.memory_space<vmem>>, vector<2x1024xf32>,
    } else {
    }
    %c0 = arith.constant 0 : index
    %c0_1 = arith.constant 0 : index
    %3 = vector.load %arg1[%c0, %c0_1] : memref<2x1024xf32, #tpu.memory_space<vmem>>, vector<2x1024xf32>
    %c0_2 = arith.constant 0 : index
    %c0_3 = arith.constant 0 : index
    %4 = vector.load %arg3[%c0_2, %c0_3] : memref<2x1024xf32, #tpu.memory_space<vmem>>, vector<2x1024xf32>
    %5 = arith.addf %4, %3 : vector<2x1024xf32>
    %c0_4 = arith.constant 0 : index
    %c0_5 = arith.constant 0 : index
    %6 = vector.load %arg3[%c0_4, %c0_5] : memref<2x1024xf32, #tpu.memory_space<vmem>>, vector<2x1024xf32>
    tpu.vector_store %arg3[%c0_4, %c0_5], %5 {strides = array<i32>} : memref<2x1024xf32, #tpu.memory_space<vmem>>, vector<2x1024xf32>,
    %c0_i32_6 = arith.constant 0 : i32
    %7 = arith.cmpi eq, %arg0, %c0_i32_6 : i32
    %8 = arith.extui %7 : i1 to i32
    %c0_i32_7 = arith.constant 0 : i32
    %9 = arith.cmpi ne, %8, %c0_i32_7 : i32
    scf.if %9 {
      %c0_8 = arith.constant 0 : index
      %c0_9 = arith.constant 0 : index
      %10 = vector.load %arg3[%c0_8, %c0_9] : memref<2x1024xf32, #tpu.memory_space<vmem>>, vector<2x1024xf32>
      %11 = vector.shape_cast %10 : vector<2x1024xf32> to vector<1x2x1024xf32>
      %cst = arith.constant dense<0.000000e+00> : vector<1xf32>
      %12 = vector.multi_reduction <add>, %11, %cst [1, 2] : vector<1x2x1024xf32> to vector<1xf32>
      %13 = vector.shape_cast %12 : vector<1xf32> to vector<1x1x1xf32>
      %14 = vector.extract %13[0, 0, 0] : f32 from vector<1x1x1xf32>
      %15 = vector.broadcast %14 : f32 to vector<1x1xf32>
      %cst_10 = arith.constant 2.44140625E-4 : f32
      %16 = vector.broadcast %cst_10 : f32 to vector<1x1xf32>
      %17 = arith.mulf %15, %16 : vector<1x1xf32>
      %c0_11 = arith.constant 0 : index
      %c0_12 = arith.constant 0 : index
      %18 = vector.load %arg2[%c0_11, %c0_12] : memref<1x1xf32, #tpu.memory_space<vmem>>, vector<1x1xf32>
      tpu.vector_store %arg2[%c0_11, %c0_12], %17 {strides = array<i32>} : memref<1x1xf32, #tpu.memory_space<vmem>>, vector<1x1xf32>,
    } else {
    }
    return
  }
  func.func @transform_0(%arg0: i32) -> (i32, i32) {
    %c0_i32 = arith.constant 0 : i32
    %c0_i32_0 = arith.constant 0 : i32
    return %arg0, %c0_i32 : i32, i32
  }
  func.func @transform_1(%arg0: i32) -> (i32, i32) {
    %c0_i32 = arith.constant 0 : i32
    %c0_i32_0 = arith.constant 0 : i32
    %c0_i32_1 = arith.constant 0 : i32
    return %c0_i32, %c0_i32_0 : i32, i32
  }
}

</mosaic_0001>

<bundles_post_ra>
// kernel: tpu_custom_call.1
= control target key start
LH: loop header
LB: loop body
LE: loop exit
PB: predicated region body
PF: predicated region fallthrough
CT: control target
= control target key end

     0   :  { %6 = vsyncpa [#allocation4], 0  ;;  %s191_s0 = inlined_call_operand.hbm [shape: f32[2,1024], index: 0, kind: input, shape index: {}]   ;;  %s192_s1 = inlined_call_operand.hbm [shape: f32[1,1], index: 1, kind: output, shape index: {}]  }
   0x1   :  { %7 = vsyncpa [#allocation5], 0  ;;  %s13_s8 = sshll.u32 %s191_s0, 4  ;;  %s165_s9 = smov [#allocation3]   ;;  %s14_s8 = int_to_ptr.hbm [resolvable:$true] %s13_s8 }
   0x2   :  { %s15_s10 = sshll.u32 %s165_s9, 4  ;;  %s16_s10 = int_to_ptr.vmem [resolvable:$true] %s15_s10 }
   0x3   :  { %18 = dma.hbm_to_vmem [thread:$0]  %s14_s8, 256, %s16_s10, [#allocation4]  }
   0x4   :  { %161 = dma.done.wait [#allocation4], 256  }
   0x5   :  { %162 = vsyncadd [#allocation4], 4294967040  ;;  %v29_v0 = vld [vmem:[#allocation3] sm:$0xff]  ;;  %v30_v1 = vld [vmem:[#allocation3 + $0x8] sm:$0xff]  ;;  %vm63_vm0 = vcmask 1041408   ;;  %s166_s0 = smov [#allocation6]  }
   0x6   :  { %44 = vst [vmem:[#allocation1] ss:$4 sm:$0xff] %v29_v0  ;;  %s97_s11 = sshll.u32 %s166_s0, 4  ;;  %s99_s14 = sshll.u32 %s192_s1, 4  ;;  %vm90_vm1 = vcmask 0   ;;  %s98_s11 = int_to_ptr.vmem [resolvable:$true] %s97_s11  ;;  %s100_s14 = int_to_ptr.hbm [resolvable:$true] %s99_s14 }
   0x7   :  { %46 = vst [vmem:[#allocation1 + $0x20] ss:$4 sm:$0xff] %v30_v1 }
   0xd   :  { %v47_v2 = vld.sshfl [vmem:[#allocation1] sm:$0xff pattern:$0x73625140]  ;;  %v48_v3 = vld.sshfl [vmem:[#allocation1 + $0x8] sm:$0xff pattern:$0x73625140] }
   0xe   :  { %v49_v4 = vld.sshfl [vmem:[#allocation1 + $0x10] sm:$0xff pattern:$0x73625140]  ;;  %v50_v5 = vld.sshfl [vmem:[#allocation1 + $0x18] sm:$0xff pattern:$0x73625140] }
   0xf   :  { %v64_v6 = vsel %vm63_vm0, %v47_v2, 0.0  ;;  %v65_v7 = vsel %vm63_vm0, %v48_v3, 0.0  ;;  %v67_v8 = vsel %vm63_vm0, %v49_v4, 0.0  ;;  %v51_v9 = vld.sshfl [vmem:[#allocation1 + $0x20] sm:$0xff pattern:$0x73625140] }
  0x10   :  { %v66_v10 = vadd.f32 %v65_v7, %v64_v6  ;;  %v69_v11 = vsel %vm63_vm0, %v50_v5, 0.0  ;;  %v52_v12 = vld.sshfl [vmem:[#allocation1 + $0x28] sm:$0xff pattern:$0x73625140]  ;;  %v71_v14 = vsel %vm63_vm0, %v51_v9, 0.0 }
  0x11   :  { %v53_v15 = vld.sshfl [vmem:[#allocation1 + $0x30] sm:$0xff pattern:$0x73625140]  ;;  %v73_v17 = vsel %vm63_vm0, %v52_v12, 0.0 }
  0x12   :  { %v68_v13 = vadd.f32 %v67_v8, %v66_v10  ;;  %v54_v18 = vld.sshfl [vmem:[#allocation1 + $0x38] sm:$0xff pattern:$0x73625140]  ;;  %v75_v20 = vsel %vm63_vm0, %v53_v15, 0.0 }
  0x13   :  { %v77_v22 = vsel %vm63_vm0, %v54_v18, 0.0 }
  0x14   :  { %v70_v16 = vadd.f32 %v69_v11, %v68_v13 }
  0x16   :  { %v72_v19 = vadd.f32 %v71_v14, %v70_v16 }
  0x18   :  { %v74_v21 = vadd.f32 %v73_v17, %v72_v19 }
  0x1a   :  { %v76_v23 = vadd.f32 %v75_v20, %v74_v21 }
  0x1c   :  { %v78_v24 = vadd.f32 %v77_v22, %v76_v23 }
  0x1e   :  { %79 = vadd.xlane.f32.xlu0 %v78_v24 }
  0x91   :  { %v80_v25 = vpop.xlane.xlu0 %79 }
  0x92   :  { %v81_v26 = vrot.slane %v80_v25, 4 }
  0x94   :  { %v82_v27 = vadd.f32 %v81_v26, %v80_v25 }
  0x96   :  { %v83_v28 = vrot.slane %v82_v27, 2 }
  0x98   :  { %v84_v29 = vadd.f32 %v83_v28, %v82_v27 }
  0x9a   :  { %v85_v30 = vrot.slane %v84_v29, 1 }
  0x9c   :  { %v86_v31 = vadd.f32 %v85_v30, %v84_v29 }
  0x9e   :  { %109 = vpush %v86_v31 }
  0xcf   :  { %s110_s15 = spop %109 }
  0xd0   :  { %v88_v32 = vstv %s110_s15 }
  0xd1   :  { %v89_v33 = vmul.f32 0.00024414063, %v88_v32 }
  0xd3   :  { %91 = vst.msk [vmem:[#allocation6] sm:$0x1] %vm90_vm1, %v89_v33 }
  0xd4   :  { %102 = dma.vmem_to_hbm [thread:$0]  %s98_s11, 16, %s100_s14, [#allocation5]  }
  0xd5   :  { %163 = dma.done.wait [#allocation5], 16  }
  0xd6   :  { %164 = vsyncadd [#allocation5], 4294967280 }
  0xd7   :  { %107 = vsyncpa [#allocation4], 1 }
  0xd8   :  { %108 = vsyncpa [#allocation5], 1 }

</bundles_post_ra>
